<compile_context>
chip_gen: v5e
topology: v5e:2x2
jax: 0.10.0
libtpu: 0.0.40
codegen_flags: <defaults>
</compile_context>

<pallas_src>
import jax
import jax.numpy as jnp
from jax.experimental import pallas as pl
from jax.experimental.pallas import tpu as pltpu


def _normalize_sections(sections, total_channels):
    """Mirror torch.split semantics: int chunk size or explicit list of sizes."""
    if isinstance(sections, int):
        sizes = [sections] * (total_channels // sections)
        rem = total_channels % sections
        if rem:
            sizes.append(rem)
        return sizes
    sizes = [int(s) for s in sections]
    assert sum(sizes) == total_channels, "sections must sum to the channel dim"
    return sizes


def _plan_chunks(sizes, bytes_per_channel, *, max_chunks_per_section=4,
                 min_chunk_bytes=1 << 20):
    """Per-section list of (channel_start_within_section, channel_len) chunks.

    Splitting a big section into a few DMAs keeps multiple DMA engines busy in
    parallel; sub-MiB sections stay a single DMA (tiny DMAs only add overhead).
    """
    plan = []
    for sz in sizes:
        sec_bytes = sz * bytes_per_channel
        n_by_size = max(1, sec_bytes // min_chunk_bytes)
        n_chunks = int(min(sz, max_chunks_per_section, n_by_size))
        base, rem = divmod(sz, n_chunks)
        chunks, start = [], 0
        for i in range(n_chunks):
            length = base + (1 if i < rem else 0)
            chunks.append((start, length))
            start += length
        plan.append(chunks)
    return plan


def _build_split_kernel(sizes, offsets, plan, hw):
    """Kernel body: issue one HBM->HBM DMA per (section, chunk), then wait all."""
    n_sections = len(sizes)

    def kernel(x_ref, *rest):
        out_refs = rest[:n_sections]
        sem = rest[n_sections]
        copies = []
        d = 0
        for s in range(n_sections):
            off = offsets[s]
            for (c0, clen) in plan[s]:
                # static element slices: section channels are contiguous in the
                # flattened (N, C*H*W) view
                src = x_ref.at[:, pl.ds((off + c0) * hw, clen * hw)]
                dst = out_refs[s].at[:, pl.ds(c0 * hw, clen * hw)]
                cp = pltpu.make_async_copy(src, dst, sem.at[d])
                cp.start()
                copies.append(cp)
                d += 1
        for cp in copies:
            cp.wait()

    n_dma = sum(len(c) for c in plan)
    return kernel, n_dma


def channel_split(x, sections):
    """Pallas implementation of ChannelSplit.forward: split NCHW tensor on dim=1."""
    N, C, H, W = x.shape
    hw = H * W
    sizes = _normalize_sections(sections, C)

    offsets, off = [], 0
    for sz in sizes:
        offsets.append(off)
        off += sz

    itemsize = jnp.dtype(x.dtype).itemsize
    plan = _plan_chunks(sizes, N * hw * itemsize)
    kernel, n_dma = _build_split_kernel(sizes, offsets, plan, hw)

    # Free view of the contiguous NCHW array; per batch row each section is a
    # single contiguous run of sz*H*W elements.
    x2 = x.reshape(N, C * hw)

    total_bytes = 2 * x.size * itemsize  # each element read once + written once

    outs2 = pl.pallas_call(
        kernel,
        out_shape=tuple(
            jax.ShapeDtypeStruct((N, sz * hw), x.dtype) for sz in sizes
        ),
        in_specs=[pl.BlockSpec(memory_space=pl.ANY)],       # raw HBM ref
        out_specs=tuple(pl.BlockSpec(memory_space=pl.ANY) for _ in sizes),
        scratch_shapes=[pltpu.SemaphoreType.DMA((n_dma,))],
        cost_estimate=pl.CostEstimate(
            flops=0, transcendentals=0, bytes_accessed=total_bytes
        ),
    )(x2)

    if not isinstance(outs2, (tuple, list)):
        outs2 = (outs2,)

    return tuple(o.reshape(N, sz, H, W) for o, sz in zip(outs2, sizes))


if __name__ == "__main__":
    key = jax.random.PRNGKey(0)
    N, C, H, W = 2, 4, 16, 16
    x = jax.random.normal(key, (N, C, H, W), dtype=jnp.float32)

    sections = (1, 3)  # matches ChannelSplit(sections=[1, 3])

    split_fn = jax.jit(channel_split, static_argnums=1)
    outs = jax.block_until_ready(split_fn(x, sections))

    # reference: plain JAX split along the channel axis
    sizes = list(sections)
    split_points, acc = [], 0
    for s in sizes[:-1]:
        acc += s
        split_points.append(acc)
    ref = jnp.split(x, split_points, axis=1)

    assert len(outs) == len(ref)
    for o, r, sz in zip(outs, ref, sizes):
        assert o.shape == (N, sz, H, W), (o.shape, sz)
        assert o.dtype == x.dtype
        assert jnp.array_equal(o, r), "mismatch vs reference split"

    # also exercise torch.split's int-`sections` (equal chunk size) path
    outs_int = jax.block_until_ready(split_fn(x, 2))
    ref_int = jnp.split(x, [2], axis=1)
    for o, r in zip(outs_int, ref_int):
        assert jnp.array_equal(o, r), "mismatch vs reference split (int sections)"

    print("KERNEL_OK")
</pallas_src>

<mosaic_0001>
module attributes {stable_mosaic.version = 11 : i64} {
  func.func @kernel(%arg0: memref<2x1024xf32, #tpu.memory_space<any>>, %arg1: memref<2x256xf32, #tpu.memory_space<any>>, %arg2: memref<2x768xf32, #tpu.memory_space<any>>, %arg3: memref<2x!tpu.dma_semaphore, #tpu.memory_space<semaphore_mem>>) attributes {dimension_semantics = [], scalar_prefetch = 0 : i64, scratch_operands = 1 : i64, tpu.core_type = #tpu.core_type<tc>} {
    %c0_i32 = arith.constant 0 : i32
    %c0_i32_0 = arith.constant 0 : i32
    %c0_i32_1 = arith.constant 0 : i32
    %0 = tpu.memref_slice %arg0[%c0_i32_0, %c0_i32_1] : memref<2x1024xf32, #tpu.memory_space<any>> -> memref<2x256xf32, #tpu.memory_space<any>>
    %c0_i32_2 = arith.constant 0 : i32
    %c0_i32_3 = arith.constant 0 : i32
    %1 = tpu.memref_slice %arg1[%c0_i32_2, %c0_i32_3] : memref<2x256xf32, #tpu.memory_space<any>> -> memref<2x256xf32, #tpu.memory_space<any>>
    %2 = tpu.memref_slice %arg3[%c0_i32] : memref<2x!tpu.dma_semaphore, #tpu.memory_space<semaphore_mem>> -> memref<1x!tpu.dma_semaphore, #tpu.memory_space<semaphore_mem>>
    %3 = tpu.memref_squeeze %2 : memref<1x!tpu.dma_semaphore, #tpu.memory_space<semaphore_mem>> -> memref<!tpu.dma_semaphore, #tpu.memory_space<semaphore_mem>>
    tpu.enqueue_dma source(%0 : memref<2x256xf32, #tpu.memory_space<any>>) target(%1 : memref<2x256xf32, #tpu.memory_space<any>>) target_semaphore(%3 : memref<!tpu.dma_semaphore, #tpu.memory_space<semaphore_mem>>)
    %c1_i32 = arith.constant 1 : i32
    %c0_i32_4 = arith.constant 0 : i32
    %c256_i32 = arith.constant 256 : i32
    %4 = tpu.memref_slice %arg0[%c0_i32_4, %c256_i32] : memref<2x1024xf32, #tpu.memory_space<any>> -> memref<2x768xf32, #tpu.memory_space<any>>
    %c0_i32_5 = arith.constant 0 : i32
    %c0_i32_6 = arith.constant 0 : i32
    %5 = tpu.memref_slice %arg2[%c0_i32_5, %c0_i32_6] : memref<2x768xf32, #tpu.memory_space<any>> -> memref<2x768xf32, #tpu.memory_space<any>>
    %6 = tpu.memref_slice %arg3[%c1_i32] : memref<2x!tpu.dma_semaphore, #tpu.memory_space<semaphore_mem>> -> memref<1x!tpu.dma_semaphore, #tpu.memory_space<semaphore_mem>>
    %7 = tpu.memref_squeeze %6 : memref<1x!tpu.dma_semaphore, #tpu.memory_space<semaphore_mem>> -> memref<!tpu.dma_semaphore, #tpu.memory_space<semaphore_mem>>
    tpu.enqueue_dma source(%4 : memref<2x768xf32, #tpu.memory_space<any>>) target(%5 : memref<2x768xf32, #tpu.memory_space<any>>) target_semaphore(%7 : memref<!tpu.dma_semaphore, #tpu.memory_space<semaphore_mem>>)
    %c0_i32_7 = arith.constant 0 : i32
    %c0_i32_8 = arith.constant 0 : i32
    %c0_i32_9 = arith.constant 0 : i32
    %8 = tpu.memref_slice %arg0[%c0_i32_8, %c0_i32_9] : memref<2x1024xf32, #tpu.memory_space<any>> -> memref<2x256xf32, #tpu.memory_space<any>>
    %c0_i32_10 = arith.constant 0 : i32
    %c0_i32_11 = arith.constant 0 : i32
    %9 = tpu.memref_slice %arg1[%c0_i32_10, %c0_i32_11] : memref<2x256xf32, #tpu.memory_space<any>> -> memref<2x256xf32, #tpu.memory_space<any>>
    %10 = tpu.memref_slice %arg3[%c0_i32_7] : memref<2x!tpu.dma_semaphore, #tpu.memory_space<semaphore_mem>> -> memref<1x!tpu.dma_semaphore, #tpu.memory_space<semaphore_mem>>
    %11 = tpu.memref_squeeze %10 : memref<1x!tpu.dma_semaphore, #tpu.memory_space<semaphore_mem>> -> memref<!tpu.dma_semaphore, #tpu.memory_space<semaphore_mem>>
    tpu.wait_dma2 semaphore(%11 : memref<!tpu.dma_semaphore, #tpu.memory_space<semaphore_mem>>) src(%8 : memref<2x256xf32, #tpu.memory_space<any>>) dst(%9 : memref<2x256xf32, #tpu.memory_space<any>>)
    %c1_i32_12 = arith.constant 1 : i32
    %c0_i32_13 = arith.constant 0 : i32
    %c256_i32_14 = arith.constant 256 : i32
    %12 = tpu.memref_slice %arg0[%c0_i32_13, %c256_i32_14] : memref<2x1024xf32, #tpu.memory_space<any>> -> memref<2x768xf32, #tpu.memory_space<any>>
    %c0_i32_15 = arith.constant 0 : i32
    %c0_i32_16 = arith.constant 0 : i32
    %13 = tpu.memref_slice %arg2[%c0_i32_15, %c0_i32_16] : memref<2x768xf32, #tpu.memory_space<any>> -> memref<2x768xf32, #tpu.memory_space<any>>
    %14 = tpu.memref_slice %arg3[%c1_i32_12] : memref<2x!tpu.dma_semaphore, #tpu.memory_space<semaphore_mem>> -> memref<1x!tpu.dma_semaphore, #tpu.memory_space<semaphore_mem>>
    %15 = tpu.memref_squeeze %14 : memref<1x!tpu.dma_semaphore, #tpu.memory_space<semaphore_mem>> -> memref<!tpu.dma_semaphore, #tpu.memory_space<semaphore_mem>>
    tpu.wait_dma2 semaphore(%15 : memref<!tpu.dma_semaphore, #tpu.memory_space<semaphore_mem>>) src(%12 : memref<2x768xf32, #tpu.memory_space<any>>) dst(%13 : memref<2x768xf32, #tpu.memory_space<any>>)
    return
  }
}

</mosaic_0001>

<bundles_post_ra>
// kernel: channel_split.1
= control target key start
LH: loop header
LB: loop body
LE: loop exit
PB: predicated region body
PF: predicated region fallthrough
CT: control target
= control target key end

     0   :  { %s149_s0 = inlined_call_operand.vmem [shape: f32[2,1024], index: 0, kind: input, shape index: {}]   ;;  %s150_s1 = inlined_call_operand.vmem [shape: f32[2,256], index: 1, kind: output, shape index: {0}]   ;;  %s151_s2 = inlined_call_operand.vmem [shape: f32[2,768], index: 2, kind: output, shape index: {1}]  }
   0x1   :  { %v22_v0 = vld [vmem:[%s149_s0] sm:$0xf] }
   0x2   :  { %23 = vst [vmem:[%s150_s1] sm:$0xf] %v22_v0 }
   0x3   :  { %41 = vsyncadd [#allocation2], 64  ;;  %v107_v1 = vld [vmem:[%s149_s0 + $0x4] sm:$0xff]  ;;  %v108_v2 = vld [vmem:[%s149_s0 + $0xc] sm:$0xf] }
   0x4   :  { %57 = vst [vmem:[%s151_s2] sm:$0xff] %v107_v1 }
   0x5   :  { %109 = vst [vmem:[%s151_s2 + $0x8] sm:$0xf] %v108_v2 }
   0x6   :  { %73 = vsyncadd [#allocation2 + $0x1], 192 }
   0x7   :  { %112 = dma.done.wait [#allocation2], 64 }
   0x8   :  { %113 = vsyncadd [#allocation2], 4294967232 }
   0x9   :  { %114 = dma.done.wait [#allocation2 + $0x1], 192 }
   0xa   :  { %115 = vsyncadd [#allocation2 + $0x1], 4294967104 }
   0xb   :  { %81 = vsyncmov [#allocation2] }
   0xe   :  { %s82_s1 = vpop.sfrf %81 }
   0xf   :  { %p110_p0 = scmp.ne.s32.totalorder %s82_s1, 0 }
  0x11   :  { %86 = shalt.err (%p110_p0)  }
  0x12   :  { %88 = vsyncmov [#allocation2 + $0x1] }
  0x15   :  { %s89_s21 = vpop.sfrf %88 }
  0x16   :  { %p111_p1 = scmp.ne.s32.totalorder %s89_s21, 0 }
  0x18   :  { %93 = shalt.err (%p111_p1)  }

</bundles_post_ra>
